<compile_context>
chip_gen: v7x
topology: tpu7x:2x2x1
jax: 0.10.0
libtpu: 0.0.40
codegen_flags: <defaults>
</compile_context>

<pallas_src>
import functools

import jax
import jax.numpy as jnp
from jax import lax
from jax.experimental import pallas as pl
from jax.experimental.pallas import tpu as pltpu


_GATE_PERM = (0, 1, 3, 2)  # blitz column order [i,f,g,o] -> kernel order [i,f,o,g]


def _round_up(n, m):
    return ((n + m - 1) // m) * m


# ----------------------------------------------------------------------------- kernel


def lstm_head_kernel(x_ref, wih_ref, whh_ref, b_ref, wo_ref, bo_ref,
                     out_ref, gx_ref, hseq_ref, h_ref, c_ref):
    """One (batch-block, T-chunk) grid step of the LSTM recurrence + linear head.

    x_ref   : (Tc, Bb, I_pad)   time-major padded input chunk (f32 or bf16)
    wih_ref : (I_pad, 4*Hs)     sampled input->gate weights, [i|f|o|g] blocks
    whh_ref : (Hs, 4*Hs)        sampled hidden->gate weights (always f32)
    b_ref   : (1, 4*Hs)         gate bias (f32; padded lanes MUST stay zero)
    wo_ref  : (Hs, O_pad)       linear head weight (already transposed)
    bo_ref  : (1, O_pad)        linear head bias (f32)
    out_ref : (Tc, Bb, O_pad)   time-major padded output chunk
    gx_ref  : (Tc, Bb, 4*Hs)    scratch: input projections for this chunk (f32)
    hseq_ref: (Tc, Bb, Hs)      scratch: hidden states for the head matmul (f32)
    h_ref   : (Bb, Hs)          scratch: hidden-state carry across T-chunks (f32)
    c_ref   : (Bb, Hs)          scratch: cell-state  carry across T-chunks (f32)

    Hs is the per-gate column stride of the packed weights:
      Hs == H            (compact packing)      when H < 128
      Hs == round_up(H,128) (lane-aligned gates) when H >= 128
    """
    Tc, Bb, Ip = x_ref.shape
    Hs = whh_ref.shape[0]
    G = 4 * Hs
    lane_aligned_gates = (Hs % 128 == 0)
    dt = wih_ref.dtype  # MXU operand dtype of stages 1/3; accumulation stays f32.

    # ---- carry init at the first T-chunk of every batch block -------------------
    @pl.when(pl.program_id(1) == 0)
    def _():
        h_ref[...] = jnp.zeros_like(h_ref)
        c_ref[...] = jnp.zeros_like(c_ref)

    # ---- Stage 1: input projection for the whole chunk in ONE MXU matmul --------
    # (Tc, Bb, Ip) -> (Tc*Bb, Ip) merges leading dims (Bb % 8 == 0, Ip % 128 == 0),
    # so the reshape is layout-preserving (no VMEM relayout copy).
    x_flat = x_ref[...].reshape(Tc * Bb, Ip)
    gx = jnp.dot(x_flat, wih_ref[...], preferred_element_type=jnp.float32)
    gx_ref[...] = (gx + b_ref[...]).reshape(Tc, Bb, G)
    # NOTE: gx could be stored in bf16 (add the f32 bias at the per-step read) to
    # halve this scratch; T-chunking already bounds it, so keep f32 for accuracy.

    whh = whh_ref[...]  # stays f32: it sits on the serial critical path.

    # ---- Stage 2: serial recurrence; h/c live in vregs as the loop carry --------
    def step(t, carry):
        h, c = carry
        gates = gx_ref[t] + jnp.dot(h, whh, preferred_element_type=jnp.float32)
        if lane_aligned_gates:
            # Per-gate blocks are lane-aligned: one sigmoid over 3*Hs, one tanh.
            sig = jax.nn.sigmoid(gates[:, :3 * Hs])
            i_t = sig[:, 0 * Hs:1 * Hs]
            f_t = sig[:, 1 * Hs:2 * Hs]
            o_t = sig[:, 2 * Hs:3 * Hs]
            g_t = jnp.tanh(gates[:, 3 * Hs:])
        else:
            # Compact packing (H < 128): the whole gate row is ~1 vreg per 8 batch
            # rows -> ONE full-vreg sigmoid + ONE full-vreg tanh on the EUP, and
            # sub-vreg lane slices (XLU, which has slack) realign the gate
            # sub-blocks to the h/c lanes.
            sig = jax.nn.sigmoid(gates)
            tnh = jnp.tanh(gates)
            i_t = sig[:, 0 * Hs:1 * Hs]
            f_t = sig[:, 1 * Hs:2 * Hs]
            o_t = sig[:, 2 * Hs:3 * Hs]
            g_t = tnh[:, 3 * Hs:4 * Hs]
        c_new = f_t * c + i_t * g_t
        h_new = o_t * jnp.tanh(c_new)
        hseq_ref[t] = h_new  # the only per-step VMEM store
        return h_new, c_new

    # Full unroll only for tiny chunks; partial unroll otherwise (avoids vreg
    # spills / code-size blowup at realistic T while keeping cross-step overlap).
    unroll = Tc if Tc <= 8 else 8
    h_last, c_last = lax.fori_loop(0, Tc, step, (h_ref[...], c_ref[...]),
                                   unroll=unroll)
    h_ref[...] = h_last
    c_ref[...] = c_last

    # ---- Stage 3: linear head as one wide, lane-dense matmul + store ------------
    h_flat = hseq_ref[...].reshape(Tc * Bb, Hs).astype(dt)
    y = jnp.dot(h_flat, wo_ref[...], preferred_element_type=jnp.float32) + bo_ref[...]
    out_ref[...] = y.reshape(Tc, Bb, -1).astype(out_ref.dtype)


# ----------------------------------------------------------------------------- glue


def _pack_gate_matrix(w, rows_pad, H, Hs):
    """(rows, 4H) blitz [i,f,g,o] -> (rows_pad, 4*Hs) kernel [i,f,o,g], zero-padded."""
    rows = w.shape[0]
    out = jnp.zeros((rows_pad, 4 * Hs), w.dtype)
    for dst, src in enumerate(_GATE_PERM):
        out = out.at[:rows, dst * Hs:dst * Hs + H].set(w[:, src * H:(src + 1) * H])
    return out


def _pack_gate_bias(b, H, Hs):
    # Padded lanes must stay exactly zero: zero weights AND zero bias on padded
    # hidden lanes => gate pre-activations 0 => c, h stay exactly 0 there.
    out = jnp.zeros((1, 4 * Hs), b.dtype)
    for dst, src in enumerate(_GATE_PERM):
        out = out.at[0, dst * Hs:dst * Hs + H].set(b[src * H:(src + 1) * H])
    return out


def _num_tensorcores():
    """Best-effort TensorCores-per-chip query (v7x: 2; v5e/v6e: 1)."""
    try:
        info = pltpu.get_tpu_info()
        for attr in ("num_cores", "core_count", "num_tensorcores"):
            n = getattr(info, attr, None)
            if isinstance(n, int) and n > 0:
                return n
    except Exception:
        pass
    try:
        n = getattr(jax.devices()[0], "num_cores", None)
        if isinstance(n, int) and n > 0:
            return n
    except Exception:
        pass
    return 1


def _const_spec(shape, single_buffer):
    """BlockSpec for a grid-invariant operand (constant index_map).

    When the operand is large, request single buffering so it is not
    double-buffered in VMEM (matters at large H on v7x's 64 MiB VMEM).
    """
    ndim = len(shape)
    index_map = lambda bb, tc: (0,) * ndim
    if single_buffer:
        try:
            return pl.BlockSpec(shape, index_map, pipeline_mode=pl.Buffered(1))
        except (TypeError, AttributeError):  # older jax without pipeline_mode
            pass
    return pl.BlockSpec(shape, index_map)


def _choose_blocks(B_pad, T, I_pad, G, Hs, O_pad, in_itemsize):
    """Explicit per-generation block policy.

    * T is chunked so per-chunk scratches / tiles stay bounded (v7x 64 MiB VMEM)
      while keeping the stage-1/3 matmul M = Tc*B_blk large.
    * B_blk is the largest sublane-aligned divisor of B_pad that fits the VMEM
      budget; on multi-TensorCore chips (v7x) it is additionally capped so the
      'parallel' batch axis has at least one block per TensorCore.
    """
    T_chunk = T if T <= 128 else 64
    T_pad = _round_up(T, T_chunk)

    # Per-batch-row VMEM bytes for one grid step (x/out double-buffered + scratches).
    per_row = (T_chunk * (I_pad * in_itemsize * 2 + O_pad * 4 * 2 + G * 4 + Hs * 4)
               + 2 * Hs * 4)
    weight_bytes = ((I_pad * G + Hs * O_pad) * in_itemsize
                    + Hs * G * 4 + (G + O_pad) * 4)

    budget = 24 << 20  # conservative; stays comfortably inside every generation
    cands = [c for c in range(8, min(B_pad, 256) + 1, 8) if B_pad % c == 0]
    fits = [c for c in cands if weight_bytes + c * per_row <= budget] or [8]
    b_blk = max(fits)
    num_cores = _num_tensorcores()
    if num_cores > 1:
        sharded = [c for c in fits if B_pad // c >= num_cores]
        if sharded:  # keep every TensorCore busy on the 'parallel' batch axis
            b_blk = max(sharded)
    est_bytes = weight_bytes + b_blk * per_row
    return T_chunk, T_pad, b_blk, weight_bytes, est_bytes


@functools.partial(jax.jit, static_argnames=("use_bf16_weights",))
def bayesian_lstm_model_forward(x, w_ih, w_hh, b, w_out, b_out,
                                use_bf16_weights=False):
    """x: (B, T, input_size) f32 -> (B, T, output_size) f32.

    w_ih (I, 4H), w_hh (H, 4H), b (4H,) are the already-sampled Bayesian LSTM
    weights in blitz gate order [i, f, g, o]; w_out = linear.weight.T (H, O),
    b_out (O,).
    """
    B, T, I = x.shape
    H = w_hh.shape[0]
    O = w_out.shape[1]

    # TPU-friendly sizes: sublane (8) on batch, lane (128) on features.
    B_pad = _round_up(max(B, 8), 8)
    I_pad = _round_up(I, 128)
    O_pad = _round_up(O, 128)
    # Gate packing: compact [i|f|o|g] with stride H when H < 128 (keeps the serial
    # step at MXU N = 4*H and ~2 EUP vregs); per-gate 128-aligned blocks otherwise.
    Hs = H if H < 128 else _round_up(H, 128)
    G = 4 * Hs

    in_dtype = jnp.bfloat16 if use_bf16_weights else jnp.float32
    in_itemsize = 2 if use_bf16_weights else 4

    T_chunk, T_pad, B_blk, weight_bytes, est_bytes = _choose_blocks(
        B_pad, T, I_pad, G, Hs, O_pad, in_itemsize)
    grid = (B_pad // B_blk, T_pad // T_chunk)
    single_buffer_weights = weight_bytes > (4 << 20)
    vmem_limit = None if est_bytes <= (14 << 20) else int(
        min(est_bytes + (8 << 20), 56 << 20))

    # ---- pack / pad weights (zero padding keeps semantics exact) ----------------
    w_ih_p = _pack_gate_matrix(w_ih, I_pad, H, Hs).astype(in_dtype)
    w_hh_p = _pack_gate_matrix(w_hh, Hs, H, Hs)           # f32: serial critical path
    b_p = _pack_gate_bias(b, H, Hs)                       # f32, padded lanes == 0
    w_out_p = (jnp.zeros((Hs, O_pad), jnp.float32).at[:H, :O].set(w_out)
               .astype(in_dtype))
    b_out_p = jnp.zeros((1, O_pad), jnp.float32).at[0, :O].set(b_out)

    # time-major + pad (+ optional bf16 cast) folded into one XLA copy.
    # Padded timesteps only occur AFTER the real T steps, so the carried state for
    # real outputs is unaffected; padded batch rows / output lanes are sliced off.
    x_p = (jnp.zeros((T_pad, B_pad, I_pad), in_dtype)
           .at[:T, :B, :I].set(jnp.transpose(x, (1, 0, 2)).astype(in_dtype)))

    out_tm = pl.pallas_call(
        lstm_head_kernel,
        out_shape=jax.ShapeDtypeStruct((T_pad, B_pad, O_pad), jnp.float32),
        grid=grid,
        in_specs=[
            pl.BlockSpec((T_chunk, B_blk, I_pad), lambda bb, tc: (tc, bb, 0)),
            _const_spec((I_pad, G), single_buffer_weights),
            _const_spec((Hs, G), single_buffer_weights),
            _const_spec((1, G), single_buffer_weights),
            _const_spec((Hs, O_pad), single_buffer_weights),
            _const_spec((1, O_pad), single_buffer_weights),
        ],
        out_specs=pl.BlockSpec((T_chunk, B_blk, O_pad), lambda bb, tc: (tc, bb, 0)),
        scratch_shapes=[
            pltpu.VMEM((T_chunk, B_blk, G), jnp.float32),   # gx: input projections
            pltpu.VMEM((T_chunk, B_blk, Hs), jnp.float32),  # h_seq for head matmul
            pltpu.VMEM((B_blk, Hs), jnp.float32),           # h carry across T-chunks
            pltpu.VMEM((B_blk, Hs), jnp.float32),           # c carry across T-chunks
        ],
        compiler_params=pltpu.CompilerParams(
            dimension_semantics=("parallel", "arbitrary"),
            vmem_limit_bytes=vmem_limit),
    )(x_p, w_ih_p, w_hh_p, b_p, w_out_p, b_out_p)

    return jnp.transpose(out_tm[:T, :B, :O], (1, 0, 2))


# ----------------------------------------------------------------------------- params & reference


def sample_bayesian_params(key, input_size, rnn_units, output_size,
                           posterior_rho_init=-6.0):
    """Deterministic 'sampling' of the Bayesian LSTM weights: w = mu + softplus(rho)*eps."""
    ks = jax.random.split(key, 8)
    H4 = 4 * rnn_units

    def sample(k_mu, k_eps, shape):
        mu = 0.1 * jax.random.normal(k_mu, shape, dtype=jnp.float32)
        rho = jnp.full(shape, posterior_rho_init, dtype=jnp.float32)
        eps = jax.random.normal(k_eps, shape, dtype=jnp.float32)
        return mu + jax.nn.softplus(rho) * eps

    w_ih = sample(ks[0], ks[1], (input_size, H4))   # blitz layout: (in, 4H)
    w_hh = sample(ks[2], ks[3], (rnn_units, H4))    # (H, 4H)
    b = sample(ks[4], ks[5], (H4,))                 # (4H,)

    # nn.Linear(rnn_units, output_size): weight (O, H), bias (O,); we store W^T.
    lin_w = 0.1 * jax.random.normal(ks[6], (output_size, rnn_units), dtype=jnp.float32)
    lin_b = 0.1 * jax.random.normal(ks[7], (output_size,), dtype=jnp.float32)
    return w_ih, w_hh, b, lin_w.T, lin_b


def reference_forward(x, w_ih, w_hh, b, w_out, b_out):
    """Pure-JAX reference matching the blitz BayesianLSTM + Linear forward."""
    B, T, I = x.shape
    H = w_hh.shape[0]
    h = jnp.zeros((B, H), jnp.float32)
    c = jnp.zeros((B, H), jnp.float32)
    outs = []
    for t in range(T):
        gates = x[:, t, :] @ w_ih + h @ w_hh + b
        i_t = jax.nn.sigmoid(gates[:, :H])
        f_t = jax.nn.sigmoid(gates[:, H:2 * H])
        g_t = jnp.tanh(gates[:, 2 * H:3 * H])
        o_t = jax.nn.sigmoid(gates[:, 3 * H:])
        c = f_t * c + i_t * g_t
        h = o_t * jnp.tanh(c)
        outs.append(h)
    hidden_seq = jnp.stack(outs, axis=1)  # (B, T, H)
    return hidden_seq @ w_out + b_out


if __name__ == "__main__":
    B, T = 2, 8
    input_size, rnn_units, output_size = 16, 32, 4

    key = jax.random.PRNGKey(0)
    k_x, k_p = jax.random.split(key)
    x = jax.random.normal(k_x, (B, T, input_size), dtype=jnp.float32)

    w_ih, w_hh, b, w_out, b_out = sample_bayesian_params(
        k_p, input_size, rnn_units, output_size)

    out = bayesian_lstm_model_forward(x, w_ih, w_hh, b, w_out, b_out)
    out = jax.block_until_ready(out)

    ref = reference_forward(x, w_ih, w_hh, b, w_out, b_out)
    assert out.shape == (B, T, output_size)
    assert jnp.allclose(out, ref, atol=5e-3, rtol=5e-3), "mismatch vs reference"

    print("KERNEL_OK")
</pallas_src>

<mosaic_0001>
module attributes {stable_mosaic.version = 11 : i64} {
  func.func @lstm_head_kernel(%arg0: i32, %arg1: i32, %arg2: memref<8x8x128xf32, #tpu.memory_space<vmem>>, %arg3: memref<128x128xf32, #tpu.memory_space<vmem>>, %arg4: memref<32x128xf32, #tpu.memory_space<vmem>>, %arg5: memref<1x128xf32, #tpu.memory_space<vmem>>, %arg6: memref<32x128xf32, #tpu.memory_space<vmem>>, %arg7: memref<1x128xf32, #tpu.memory_space<vmem>>, %arg8: memref<8x8x128xf32, #tpu.memory_space<vmem>>, %arg9: memref<8x8x128xf32, #tpu.memory_space<vmem>>, %arg10: memref<8x8x32xf32, #tpu.memory_space<vmem>>, %arg11: memref<8x32xf32, #tpu.memory_space<vmem>>, %arg12: memref<8x32xf32, #tpu.memory_space<vmem>>) attributes {dimension_semantics = [#tpu.dimension_semantics<parallel>, #tpu.dimension_semantics<arbitrary>], iteration_bounds = array<i64: 1, 1>, scalar_prefetch = 0 : i64, scratch_operands = 4 : i64, tpu.core_type = #tpu.core_type<tc>, window_params = [{transform_indices = @transform_0, window_bounds = array<i64: 8, 8, 128>}, {pipeline_mode = #tpu.pipeline_mode<synchronous>, transform_indices = @transform_1, window_bounds = array<i64: 128, 128>}, {pipeline_mode = #tpu.pipeline_mode<synchronous>, transform_indices = @transform_2, window_bounds = array<i64: 32, 128>}, {pipeline_mode = #tpu.pipeline_mode<synchronous>, transform_indices = @transform_3, window_bounds = array<i64: 1, 128>}, {pipeline_mode = #tpu.pipeline_mode<synchronous>, transform_indices = @transform_4, window_bounds = array<i64: 32, 128>}, {pipeline_mode = #tpu.pipeline_mode<synchronous>, transform_indices = @transform_5, window_bounds = array<i64: 1, 128>}, {transform_indices = @transform_6, window_bounds = array<i64: 8, 8, 128>}]} {
    %c0_i32 = arith.constant 0 : i32
    %0 = arith.cmpi eq, %arg1, %c0_i32 : i32
    %1 = arith.extui %0 : i1 to i32
    %c0_i32_0 = arith.constant 0 : i32
    %2 = arith.cmpi ne, %1, %c0_i32_0 : i32
    scf.if %2 {
      %cst_80 = arith.constant 0.000000e+00 : f32
      %218 = vector.broadcast %cst_80 : f32 to vector<8x32xf32>
      %c0_81 = arith.constant 0 : index
      %c0_82 = arith.constant 0 : index
      %219 = vector.load %arg11[%c0_81, %c0_82] : memref<8x32xf32, #tpu.memory_space<vmem>>, vector<8x32xf32>
      tpu.vector_store %arg11[%c0_81, %c0_82], %218 {strides = array<i32>} : memref<8x32xf32, #tpu.memory_space<vmem>>, vector<8x32xf32>,
      %cst_83 = arith.constant 0.000000e+00 : f32
      %220 = vector.broadcast %cst_83 : f32 to vector<8x32xf32>
      %c0_84 = arith.constant 0 : index
      %c0_85 = arith.constant 0 : index
      %221 = vector.load %arg12[%c0_84, %c0_85] : memref<8x32xf32, #tpu.memory_space<vmem>>, vector<8x32xf32>
      tpu.vector_store %arg12[%c0_84, %c0_85], %220 {strides = array<i32>} : memref<8x32xf32, #tpu.memory_space<vmem>>, vector<8x32xf32>,
    } else {
    }
    %c0 = arith.constant 0 : index
    %c0_1 = arith.constant 0 : index
    %c0_2 = arith.constant 0 : index
    %3 = vector.load %arg2[%c0, %c0_1, %c0_2] : memref<8x8x128xf32, #tpu.memory_space<vmem>>, vector<8x8x128xf32>
    %4 = vector.shape_cast %3 : vector<8x8x128xf32> to vector<64x128xf32>
    %c0_3 = arith.constant 0 : index
    %c0_4 = arith.constant 0 : index
    %5 = vector.load %arg3[%c0_3, %c0_4] : memref<128x128xf32, #tpu.memory_space<vmem>>, vector<128x128xf32>
    %cst = arith.constant dense<0.000000e+00> : vector<64x128xf32>
    %6 = tpu.matmul %4, %5, %cst {dimension_numbers = #tpu.dot_dimension_numbers<[1], [0], [0], [1], [0, 0, 1, 1], [], []>} : vector<64x128xf32>, vector<128x128xf32>, vector<64x128xf32> -> vector<64x128xf32>
    %c0_5 = arith.constant 0 : index
    %c0_6 = arith.constant 0 : index
    %7 = vector.load %arg5[%c0_5, %c0_6] : memref<1x128xf32, #tpu.memory_space<vmem>>, vector<1x128xf32>
    %8 = vector.broadcast %7 : vector<1x128xf32> to vector<64x128xf32>
    %9 = arith.addf %6, %8 : vector<64x128xf32>
    %10 = vector.shape_cast %9 : vector<64x128xf32> to vector<8x8x128xf32>
    %c0_7 = arith.constant 0 : index
    %c0_8 = arith.constant 0 : index
    %c0_9 = arith.constant 0 : index
    %11 = vector.load %arg9[%c0_7, %c0_8, %c0_9] : memref<8x8x128xf32, #tpu.memory_space<vmem>>, vector<8x8x128xf32>
    tpu.vector_store %arg9[%c0_7, %c0_8, %c0_9], %10 {strides = array<i32>} : memref<8x8x128xf32, #tpu.memory_space<vmem>>, vector<8x8x128xf32>,
    %c0_10 = arith.constant 0 : index
    %c0_11 = arith.constant 0 : index
    %12 = vector.load %arg4[%c0_10, %c0_11] : memref<32x128xf32, #tpu.memory_space<vmem>>, vector<32x128xf32>
    %c0_12 = arith.constant 0 : index
    %c0_13 = arith.constant 0 : index
    %13 = vector.load %arg11[%c0_12, %c0_13] : memref<8x32xf32, #tpu.memory_space<vmem>>, vector<8x32xf32>
    %c0_14 = arith.constant 0 : index
    %c0_15 = arith.constant 0 : index
    %14 = vector.load %arg12[%c0_14, %c0_15] : memref<8x32xf32, #tpu.memory_space<vmem>>, vector<8x32xf32>
    %c0_i32_16 = arith.constant 0 : i32
    %15 = arith.index_cast %c0_i32_16 : i32 to index
    %c0_17 = arith.constant 0 : index
    %c0_18 = arith.constant 0 : index
    %16 = vector.load %arg9[%15, %c0_17, %c0_18] : memref<8x8x128xf32, #tpu.memory_space<vmem>>, vector<1x8x128xf32>
    %17 = vector.shape_cast %16 : vector<1x8x128xf32> to vector<8x128xf32>
    %cst_19 = arith.constant dense<0.000000e+00> : vector<8x128xf32>
    %18 = tpu.matmul %13, %12, %cst_19 {dimension_numbers = #tpu.dot_dimension_numbers<[1], [0], [0], [1], [0, 0, 1, 1], [], []>} : vector<8x32xf32>, vector<32x128xf32>, vector<8x128xf32> -> vector<8x128xf32>
    %19 = arith.addf %17, %18 : vector<8x128xf32>
    %20 = arith.negf %19 : vector<8x128xf32>
    %21 = math.exp %20 : vector<8x128xf32>
    %cst_20 = arith.constant 1.000000e+00 : f32
    %22 = vector.broadcast %cst_20 : f32 to vector<8x128xf32>
    %23 = arith.addf %22, %21 : vector<8x128xf32>
    %24 = arith.divf %22, %23 : vector<8x128xf32>
    %25 = math.tanh %19 : vector<8x128xf32>
    %26 = vector.extract_strided_slice %24 {offsets = [0, 0], sizes = [8, 32], strides = [1, 1]} : vector<8x128xf32> to vector<8x32xf32>
    %27 = vector.extract_strided_slice %24 {offsets = [0, 32], sizes = [8, 32], strides = [1, 1]} : vector<8x128xf32> to vector<8x32xf32>
    %28 = vector.extract_strided_slice %24 {offsets = [0, 64], sizes = [8, 32], strides = [1, 1]} : vector<8x128xf32> to vector<8x32xf32>
    %29 = vector.extract_strided_slice %25 {offsets = [0, 96], sizes = [8, 32], strides = [1, 1]} : vector<8x128xf32> to vector<8x32xf32>
    %30 = arith.mulf %27, %14 : vector<8x32xf32>
    %31 = arith.mulf %26, %29 : vector<8x32xf32>
    %32 = arith.addf %30, %31 : vector<8x32xf32>
    %33 = math.tanh %32 : vector<8x32xf32>
    %34 = arith.mulf %28, %33 : vector<8x32xf32>
    %35 = arith.index_cast %c0_i32_16 : i32 to index
    %c0_21 = arith.constant 0 : index
    %c0_22 = arith.constant 0 : index
    %36 = vector.load %arg10[%35, %c0_21, %c0_22] : memref<8x8x32xf32, #tpu.memory_space<vmem>>, vector<1x8x32xf32>
    %37 = vector.shape_cast %36 : vector<1x8x32xf32> to vector<8x32xf32>
    %38 = vector.shape_cast %34 : vector<8x32xf32> to vector<1x8x32xf32>
    tpu.vector_store %arg10[%35, %c0_21, %c0_22], %38 {strides = array<i32>} : memref<8x8x32xf32, #tpu.memory_space<vmem>>, vector<1x8x32xf32>,
    %c1_i32 = arith.constant 1 : i32
    %39 = arith.index_cast %c1_i32 : i32 to index
    %c0_23 = arith.constant 0 : index
    %c0_24 = arith.constant 0 : index
    %40 = vector.load %arg9[%39, %c0_23, %c0_24] : memref<8x8x128xf32, #tpu.memory_space<vmem>>, vector<1x8x128xf32>
    %41 = vector.shape_cast %40 : vector<1x8x128xf32> to vector<8x128xf32>
    %cst_25 = arith.constant dense<0.000000e+00> : vector<8x128xf32>
    %42 = tpu.matmul %34, %12, %cst_25 {dimension_numbers = #tpu.dot_dimension_numbers<[1], [0], [0], [1], [0, 0, 1, 1], [], []>} : vector<8x32xf32>, vector<32x128xf32>, vector<8x128xf32> -> vector<8x128xf32>
    %43 = arith.addf %41, %42 : vector<8x128xf32>
    %44 = arith.negf %43 : vector<8x128xf32>
    %45 = math.exp %44 : vector<8x128xf32>
    %cst_26 = arith.constant 1.000000e+00 : f32
    %46 = vector.broadcast %cst_26 : f32 to vector<8x128xf32>
    %47 = arith.addf %46, %45 : vector<8x128xf32>
    %48 = arith.divf %46, %47 : vector<8x128xf32>
    %49 = math.tanh %43 : vector<8x128xf32>
    %50 = vector.extract_strided_slice %48 {offsets = [0, 0], sizes = [8, 32], strides = [1, 1]} : vector<8x128xf32> to vector<8x32xf32>
    %51 = vector.extract_strided_slice %48 {offsets = [0, 32], sizes = [8, 32], strides = [1, 1]} : vector<8x128xf32> to vector<8x32xf32>
    %52 = vector.extract_strided_slice %48 {offsets = [0, 64], sizes = [8, 32], strides = [1, 1]} : vector<8x128xf32> to vector<8x32xf32>
    %53 = vector.extract_strided_slice %49 {offsets = [0, 96], sizes = [8, 32], strides = [1, 1]} : vector<8x128xf32> to vector<8x32xf32>
    %54 = arith.mulf %51, %32 : vector<8x32xf32>
    %55 = arith.mulf %50, %53 : vector<8x32xf32>
    %56 = arith.addf %54, %55 : vector<8x32xf32>
    %57 = math.tanh %56 : vector<8x32xf32>
    %58 = arith.mulf %52, %57 : vector<8x32xf32>
    %59 = arith.index_cast %c1_i32 : i32 to index
    %c0_27 = arith.constant 0 : index
    %c0_28 = arith.constant 0 : index
    %60 = vector.load %arg10[%59, %c0_27, %c0_28] : memref<8x8x32xf32, #tpu.memory_space<vmem>>, vector<1x8x32xf32>
    %61 = vector.shape_cast %60 : vector<1x8x32xf32> to vector<8x32xf32>
    %62 = vector.shape_cast %58 : vector<8x32xf32> to vector<1x8x32xf32>
    tpu.vector_store %arg10[%59, %c0_27, %c0_28], %62 {strides = array<i32>} : memref<8x8x32xf32, #tpu.memory_space<vmem>>, vector<1x8x32xf32>,
    %c2_i32 = arith.constant 2 : i32
    %63 = arith.index_cast %c2_i32 : i32 to index
    %c0_29 = arith.constant 0 : index
    %c0_30 = arith.constant 0 : index
    %64 = vector.load %arg9[%63, %c0_29, %c0_30] : memref<8x8x128xf32, #tpu.memory_space<vmem>>, vector<1x8x128xf32>
    %65 = vector.shape_cast %64 : vector<1x8x128xf32> to vector<8x128xf32>
    %cst_31 = arith.constant dense<0.000000e+00> : vector<8x128xf32>
    %66 = tpu.matmul %58, %12, %cst_31 {dimension_numbers = #tpu.dot_dimension_numbers<[1], [0], [0], [1], [0, 0, 1, 1], [], []>} : vector<8x32xf32>, vector<32x128xf32>, vector<8x128xf32> -> vector<8x128xf32>
    %67 = arith.addf %65, %66 : vector<8x128xf32>
    %68 = arith.negf %67 : vector<8x128xf32>
    %69 = math.exp %68 : vector<8x128xf32>
    %cst_32 = arith.constant 1.000000e+00 : f32
    %70 = vector.broadcast %cst_32 : f32 to vector<8x128xf32>
    %71 = arith.addf %70, %69 : vector<8x128xf32>
    %72 = arith.divf %70, %71 : vector<8x128xf32>
    %73 = math.tanh %67 : vector<8x128xf32>
    %74 = vector.extract_strided_slice %72 {offsets = [0, 0], sizes = [8, 32], strides = [1, 1]} : vector<8x128xf32> to vector<8x32xf32>
    %75 = vector.extract_strided_slice %72 {offsets = [0, 32], sizes = [8, 32], strides = [1, 1]} : vector<8x128xf32> to vector<8x32xf32>
    %76 = vector.extract_strided_slice %72 {offsets = [0, 64], sizes = [8, 32], strides = [1, 1]} : vector<8x128xf32> to vector<8x32xf32>
    %77 = vector.extract_strided_slice %73 {offsets = [0, 96], sizes = [8, 32], strides = [1, 1]} : vector<8x128xf32> to vector<8x32xf32>
    %78 = arith.mulf %75, %56 : vector<8x32xf32>
    %79 = arith.mulf %74, %77 : vector<8x32xf32>
    %80 = arith.addf %78, %79 : vector<8x32xf32>
    %81 = math.tanh %80 : vector<8x32xf32>
    %82 = arith.mulf %76, %81 : vector<8x32xf32>
    %83 = arith.index_cast %c2_i32 : i32 to index
    %c0_33 = arith.constant 0 : index
    %c0_34 = arith.constant 0 : index
    %84 = vector.load %arg10[%83, %c0_33, %c0_34] : memref<8x8x32xf32, #tpu.memory_space<vmem>>, vector<1x8x32xf32>
    %85 = vector.shape_cast %84 : vector<1x8x32xf32> to vector<8x32xf32>
    %86 = vector.shape_cast %82 : vector<8x32xf32> to vector<1x8x32xf32>
    tpu.vector_store %arg10[%83, %c0_33, %c0_34], %86 {strides = array<i32>} : memref<8x8x32xf32, #tpu.memory_space<vmem>>, vector<1x8x32xf32>,
    %c3_i32 = arith.constant 3 : i32
    %87 = arith.index_cast %c3_i32 : i32 to index
    %c0_35 = arith.constant 0 : index
    %c0_36 = arith.constant 0 : index
    %88 = vector.load %arg9[%87, %c0_35, %c0_36] : memref<8x8x128xf32, #tpu.memory_space<vmem>>, vector<1x8x128xf32>
    %89 = vector.shape_cast %88 : vector<1x8x128xf32> to vector<8x128xf32>
    %cst_37 = arith.constant dense<0.000000e+00> : vector<8x128xf32>
    %90 = tpu.matmul %82, %12, %cst_37 {dimension_numbers = #tpu.dot_dimension_numbers<[1], [0], [0], [1], [0, 0, 1, 1], [], []>} : vector<8x32xf32>, vector<32x128xf32>, vector<8x128xf32> -> vector<8x128xf32>
    %91 = arith.addf %89, %90 : vector<8x128xf32>
    %92 = arith.negf %91 : vector<8x128xf32>
    %93 = math.exp %92 : vector<8x128xf32>
    %cst_38 = arith.constant 1.000000e+00 : f32
    %94 = vector.broadcast %cst_38 : f32 to vector<8x128xf32>
    %95 = arith.addf %94, %93 : vector<8x128xf32>
    %96 = arith.divf %94, %95 : vector<8x128xf32>
    %97 = math.tanh %91 : vector<8x128xf32>
    %98 = vector.extract_strided_slice %96 {offsets = [0, 0], sizes = [8, 32], strides = [1, 1]} : vector<8x128xf32> to vector<8x32xf32>
    %99 = vector.extract_strided_slice %96 {offsets = [0, 32], sizes = [8, 32], strides = [1, 1]} : vector<8x128xf32> to vector<8x32xf32>
    %100 = vector.extract_strided_slice %96 {offsets = [0, 64], sizes = [8, 32], strides = [1, 1]} : vector<8x128xf32> to vector<8x32xf32>
    %101 = vector.extract_strided_slice %97 {offsets = [0, 96], sizes = [8, 32], strides = [1, 1]} : vector<8x128xf32> to vector<8x32xf32>
    %102 = arith.mulf %99, %80 : vector<8x32xf32>
    %103 = arith.mulf %98, %101 : vector<8x32xf32>
    %104 = arith.addf %102, %103 : vector<8x32xf32>
    %105 = math.tanh %104 : vector<8x32xf32>
    %106 = arith.mulf %100, %105 : vector<8x32xf32>
    %107 = arith.index_cast %c3_i32 : i32 to index
    %c0_39 = arith.constant 0 : index
    %c0_40 = arith.constant 0 : index
    %108 = vector.load %arg10[%107, %c0_39, %c0_40] : memref<8x8x32xf32, #tpu.memory_space<vmem>>, vector<1x8x32xf32>
    %109 = vector.shape_cast %108 : vector<1x8x32xf32> to vector<8x32xf32>
    %110 = vector.shape_cast %106 : vector<8x32xf32> to vector<1x8x32xf32>
    tpu.vector_store %arg10[%107, %c0_39, %c0_40], %110 {strides = array<i32>} : memref<8x8x32xf32, #tpu.memory_space<vmem>>, vector<1x8x32xf32>,
    %c4_i32 = arith.constant 4 : i32
    %111 = arith.index_cast %c4_i32 : i32 to index
    %c0_41 = arith.constant 0 : index
    %c0_42 = arith.constant 0 : index
    %112 = vector.load %arg9[%111, %c0_41, %c0_42] : memref<8x8x128xf32, #tpu.memory_space<vmem>>, vector<1x8x128xf32>
    %113 = vector.shape_cast %112 : vector<1x8x128xf32> to vector<8x128xf32>
    %cst_43 = arith.constant dense<0.000000e+00> : vector<8x128xf32>
    %114 = tpu.matmul %106, %12, %cst_43 {dimension_numbers = #tpu.dot_dimension_numbers<[1], [0], [0], [1], [0, 0, 1, 1], [], []>} : vector<8x32xf32>, vector<32x128xf32>, vector<8x128xf32> -> vector<8x128xf32>
    %115 = arith.addf %113, %114 : vector<8x128xf32>
    %116 = arith.negf %115 : vector<8x128xf32>
    %117 = math.exp %116 : vector<8x128xf32>
    %cst_44 = arith.constant 1.000000e+00 : f32
    %118 = vector.broadcast %cst_44 : f32 to vector<8x128xf32>
    %119 = arith.addf %118, %117 : vector<8x128xf32>
    %120 = arith.divf %118, %119 : vector<8x128xf32>
    %121 = math.tanh %115 : vector<8x128xf32>
    %122 = vector.extract_strided_slice %120 {offsets = [0, 0], sizes = [8, 32], strides = [1, 1]} : vector<8x128xf32> to vector<8x32xf32>
    %123 = vector.extract_strided_slice %120 {offsets = [0, 32], sizes = [8, 32], strides = [1, 1]} : vector<8x128xf32> to vector<8x32xf32>
    %124 = vector.extract_strided_slice %120 {offsets = [0, 64], sizes = [8, 32], strides = [1, 1]} : vector<8x128xf32> to vector<8x32xf32>
    %125 = vector.extract_strided_slice %121 {offsets = [0, 96], sizes = [8, 32], strides = [1, 1]} : vector<8x128xf32> to vector<8x32xf32>
    %126 = arith.mulf %123, %104 : vector<8x32xf32>
    %127 = arith.mulf %122, %125 : vector<8x32xf32>
    %128 = arith.addf %126, %127 : vector<8x32xf32>
    %129 = math.tanh %128 : vector<8x32xf32>
    %130 = arith.mulf %124, %129 : vector<8x32xf32>
    %131 = arith.index_cast %c4_i32 : i32 to index
    %c0_45 = arith.constant 0 : index
    %c0_46 = arith.constant 0 : index
    %132 = vector.load %arg10[%131, %c0_45, %c0_46] : memref<8x8x32xf32, #tpu.memory_space<vmem>>, vector<1x8x32xf32>
    %133 = vector.shape_cast %132 : vector<1x8x32xf32> to vector<8x32xf32>
    %134 = vector.shape_cast %130 : vector<8x32xf32> to vector<1x8x32xf32>
    tpu.vector_store %arg10[%131, %c0_45, %c0_46], %134 {strides = array<i32>} : memref<8x8x32xf32, #tpu.memory_space<vmem>>, vector<1x8x32xf32>,
    %c5_i32 = arith.constant 5 : i32
    %135 = arith.index_cast %c5_i32 : i32 to index
    %c0_47 = arith.constant 0 : index
    %c0_48 = arith.constant 0 : index
    %136 = vector.load %arg9[%135, %c0_47, %c0_48] : memref<8x8x128xf32, #tpu.memory_space<vmem>>, vector<1x8x128xf32>
    %137 = vector.shape_cast %136 : vector<1x8x128xf32> to vector<8x128xf32>
    %cst_49 = arith.constant dense<0.000000e+00> : vector<8x128xf32>
    %138 = tpu.matmul %130, %12, %cst_49 {dimension_numbers = #tpu.dot_dimension_numbers<[1], [0], [0], [1], [0, 0, 1, 1], [], []>} : vector<8x32xf32>, vector<32x128xf32>, vector<8x128xf32> -> vector<8x128xf32>
    %139 = arith.addf %137, %138 : vector<8x128xf32>
    %140 = arith.negf %139 : vector<8x128xf32>
    %141 = math.exp %140 : vector<8x128xf32>
    %cst_50 = arith.constant 1.000000e+00 : f32
    %142 = vector.broadcast %cst_50 : f32 to vector<8x128xf32>
    %143 = arith.addf %142, %141 : vector<8x128xf32>
    %144 = arith.divf %142, %143 : vector<8x128xf32>
    %145 = math.tanh %139 : vector<8x128xf32>
    %146 = vector.extract_strided_slice %144 {offsets = [0, 0], sizes = [8, 32], strides = [1, 1]} : vector<8x128xf32> to vector<8x32xf32>
    %147 = vector.extract_strided_slice %144 {offsets = [0, 32], sizes = [8, 32], strides = [1, 1]} : vector<8x128xf32> to vector<8x32xf32>
    %148 = vector.extract_strided_slice %144 {offsets = [0, 64], sizes = [8, 32], strides = [1, 1]} : vector<8x128xf32> to vector<8x32xf32>
    %149 = vector.extract_strided_slice %145 {offsets = [0, 96], sizes = [8, 32], strides = [1, 1]} : vector<8x128xf32> to vector<8x32xf32>
    %150 = arith.mulf %147, %128 : vector<8x32xf32>
    %151 = arith.mulf %146, %149 : vector<8x32xf32>
    %152 = arith.addf %150, %151 : vector<8x32xf32>
    %153 = math.tanh %152 : vector<8x32xf32>
    %154 = arith.mulf %148, %153 : vector<8x32xf32>
    %155 = arith.index_cast %c5_i32 : i32 to index
    %c0_51 = arith.constant 0 : index
    %c0_52 = arith.constant 0 : index
    %156 = vector.load %arg10[%155, %c0_51, %c0_52] : memref<8x8x32xf32, #tpu.memory_space<vmem>>, vector<1x8x32xf32>
    %157 = vector.shape_cast %156 : vector<1x8x32xf32> to vector<8x32xf32>
    %158 = vector.shape_cast %154 : vector<8x32xf32> to vector<1x8x32xf32>
    tpu.vector_store %arg10[%155, %c0_51, %c0_52], %158 {strides = array<i32>} : memref<8x8x32xf32, #tpu.memory_space<vmem>>, vector<1x8x32xf32>,
    %c6_i32 = arith.constant 6 : i32
    %159 = arith.index_cast %c6_i32 : i32 to index
    %c0_53 = arith.constant 0 : index
    %c0_54 = arith.constant 0 : index
    %160 = vector.load %arg9[%159, %c0_53, %c0_54] : memref<8x8x128xf32, #tpu.memory_space<vmem>>, vector<1x8x128xf32>
    %161 = vector.shape_cast %160 : vector<1x8x128xf32> to vector<8x128xf32>
    %cst_55 = arith.constant dense<0.000000e+00> : vector<8x128xf32>
    %162 = tpu.matmul %154, %12, %cst_55 {dimension_numbers = #tpu.dot_dimension_numbers<[1], [0], [0], [1], [0, 0, 1, 1], [], []>} : vector<8x32xf32>, vector<32x128xf32>, vector<8x128xf32> -> vector<8x128xf32>
    %163 = arith.addf %161, %162 : vector<8x128xf32>
    %164 = arith.negf %163 : vector<8x128xf32>
    %165 = math.exp %164 : vector<8x128xf32>
    %cst_56 = arith.constant 1.000000e+00 : f32
    %166 = vector.broadcast %cst_56 : f32 to vector<8x128xf32>
    %167 = arith.addf %166, %165 : vector<8x128xf32>
    %168 = arith.divf %166, %167 : vector<8x128xf32>
    %169 = math.tanh %163 : vector<8x128xf32>
    %170 = vector.extract_strided_slice %168 {offsets = [0, 0], sizes = [8, 32], strides = [1, 1]} : vector<8x128xf32> to vector<8x32xf32>
    %171 = vector.extract_strided_slice %168 {offsets = [0, 32], sizes = [8, 32], strides = [1, 1]} : vector<8x128xf32> to vector<8x32xf32>
    %172 = vector.extract_strided_slice %168 {offsets = [0, 64], sizes = [8, 32], strides = [1, 1]} : vector<8x128xf32> to vector<8x32xf32>
    %173 = vector.extract_strided_slice %169 {offsets = [0, 96], sizes = [8, 32], strides = [1, 1]} : vector<8x128xf32> to vector<8x32xf32>
    %174 = arith.mulf %171, %152 : vector<8x32xf32>
    %175 = arith.mulf %170, %173 : vector<8x32xf32>
    %176 = arith.addf %174, %175 : vector<8x32xf32>
    %177 = math.tanh %176 : vector<8x32xf32>
    %178 = arith.mulf %172, %177 : vector<8x32xf32>
    %179 = arith.index_cast %c6_i32 : i32 to index
    %c0_57 = arith.constant 0 : index
    %c0_58 = arith.constant 0 : index
    %180 = vector.load %arg10[%179, %c0_57, %c0_58] : memref<8x8x32xf32, #tpu.memory_space<vmem>>, vector<1x8x32xf32>
    %181 = vector.shape_cast %180 : vector<1x8x32xf32> to vector<8x32xf32>
    %182 = vector.shape_cast %178 : vector<8x32xf32> to vector<1x8x32xf32>
    tpu.vector_store %arg10[%179, %c0_57, %c0_58], %182 {strides = array<i32>} : memref<8x8x32xf32, #tpu.memory_space<vmem>>, vector<1x8x32xf32>,
    %c7_i32 = arith.constant 7 : i32
    %183 = arith.index_cast %c7_i32 : i32 to index
    %c0_59 = arith.constant 0 : index
    %c0_60 = arith.constant 0 : index
    %184 = vector.load %arg9[%183, %c0_59, %c0_60] : memref<8x8x128xf32, #tpu.memory_space<vmem>>, vector<1x8x128xf32>
    %185 = vector.shape_cast %184 : vector<1x8x128xf32> to vector<8x128xf32>
    %cst_61 = arith.constant dense<0.000000e+00> : vector<8x128xf32>
    %186 = tpu.matmul %178, %12, %cst_61 {dimension_numbers = #tpu.dot_dimension_numbers<[1], [0], [0], [1], [0, 0, 1, 1], [], []>} : vector<8x32xf32>, vector<32x128xf32>, vector<8x128xf32> -> vector<8x128xf32>
    %187 = arith.addf %185, %186 : vector<8x128xf32>
    %188 = arith.negf %187 : vector<8x128xf32>
    %189 = math.exp %188 : vector<8x128xf32>
    %cst_62 = arith.constant 1.000000e+00 : f32
    %190 = vector.broadcast %cst_62 : f32 to vector<8x128xf32>
    %191 = arith.addf %190, %189 : vector<8x128xf32>
    %192 = arith.divf %190, %191 : vector<8x128xf32>
    %193 = math.tanh %187 : vector<8x128xf32>
    %194 = vector.extract_strided_slice %192 {offsets = [0, 0], sizes = [8, 32], strides = [1, 1]} : vector<8x128xf32> to vector<8x32xf32>
    %195 = vector.extract_strided_slice %192 {offsets = [0, 32], sizes = [8, 32], strides = [1, 1]} : vector<8x128xf32> to vector<8x32xf32>
    %196 = vector.extract_strided_slice %192 {offsets = [0, 64], sizes = [8, 32], strides = [1, 1]} : vector<8x128xf32> to vector<8x32xf32>
    %197 = vector.extract_strided_slice %193 {offsets = [0, 96], sizes = [8, 32], strides = [1, 1]} : vector<8x128xf32> to vector<8x32xf32>
    %198 = arith.mulf %195, %176 : vector<8x32xf32>
    %199 = arith.mulf %194, %197 : vector<8x32xf32>
    %200 = arith.addf %198, %199 : vector<8x32xf32>
    %201 = math.tanh %200 : vector<8x32xf32>
    %202 = arith.mulf %196, %201 : vector<8x32xf32>
    %203 = arith.index_cast %c7_i32 : i32 to index
    %c0_63 = arith.constant 0 : index
    %c0_64 = arith.constant 0 : index
    %204 = vector.load %arg10[%203, %c0_63, %c0_64] : memref<8x8x32xf32, #tpu.memory_space<vmem>>, vector<1x8x32xf32>
    %205 = vector.shape_cast %204 : vector<1x8x32xf32> to vector<8x32xf32>
    %206 = vector.shape_cast %202 : vector<8x32xf32> to vector<1x8x32xf32>
    tpu.vector_store %arg10[%203, %c0_63, %c0_64], %206 {strides = array<i32>} : memref<8x8x32xf32, #tpu.memory_space<vmem>>, vector<1x8x32xf32>,
    %c8_i32 = arith.constant 8 : i32
    %c0_65 = arith.constant 0 : index
    %c0_66 = arith.constant 0 : index
    %207 = vector.load %arg11[%c0_65, %c0_66] : memref<8x32xf32, #tpu.memory_space<vmem>>, vector<8x32xf32>
    tpu.vector_store %arg11[%c0_65, %c0_66], %202 {strides = array<i32>} : memref<8x32xf32, #tpu.memory_space<vmem>>, vector<8x32xf32>,
    %c0_67 = arith.constant 0 : index
    %c0_68 = arith.constant 0 : index
    %208 = vector.load %arg12[%c0_67, %c0_68] : memref<8x32xf32, #tpu.memory_space<vmem>>, vector<8x32xf32>
    tpu.vector_store %arg12[%c0_67, %c0_68], %200 {strides = array<i32>} : memref<8x32xf32, #tpu.memory_space<vmem>>, vector<8x32xf32>,
    %c0_69 = arith.constant 0 : index
    %c0_70 = arith.constant 0 : index
    %c0_71 = arith.constant 0 : index
    %209 = vector.load %arg10[%c0_69, %c0_70, %c0_71] : memref<8x8x32xf32, #tpu.memory_space<vmem>>, vector<8x8x32xf32>
    %210 = vector.shape_cast %209 : vector<8x8x32xf32> to vector<64x32xf32>
    %c0_72 = arith.constant 0 : index
    %c0_73 = arith.constant 0 : index
    %211 = vector.load %arg6[%c0_72, %c0_73] : memref<32x128xf32, #tpu.memory_space<vmem>>, vector<32x128xf32>
    %cst_74 = arith.constant dense<0.000000e+00> : vector<64x128xf32>
    %212 = tpu.matmul %210, %211, %cst_74 {dimension_numbers = #tpu.dot_dimension_numbers<[1], [0], [0], [1], [0, 0, 1, 1], [], []>} : vector<64x32xf32>, vector<32x128xf32>, vector<64x128xf32> -> vector<64x128xf32>
    %c0_75 = arith.constant 0 : index
    %c0_76 = arith.constant 0 : index
    %213 = vector.load %arg7[%c0_75, %c0_76] : memref<1x128xf32, #tpu.memory_space<vmem>>, vector<1x128xf32>
    %214 = vector.broadcast %213 : vector<1x128xf32> to vector<64x128xf32>
    %215 = arith.addf %212, %214 : vector<64x128xf32>
    %216 = vector.shape_cast %215 : vector<64x128xf32> to vector<8x8x128xf32>
    %c0_77 = arith.constant 0 : index
    %c0_78 = arith.constant 0 : index
    %c0_79 = arith.constant 0 : index
    %217 = vector.load %arg8[%c0_77, %c0_78, %c0_79] : memref<8x8x128xf32, #tpu.memory_space<vmem>>, vector<8x8x128xf32>
    tpu.vector_store %arg8[%c0_77, %c0_78, %c0_79], %216 {strides = array<i32>} : memref<8x8x128xf32, #tpu.memory_space<vmem>>, vector<8x8x128xf32>,
    return
  }
  func.func @transform_0(%arg0: i32, %arg1: i32) -> (i32, i32, i32) {
    %c0_i32 = arith.constant 0 : i32
    %c0_i32_0 = arith.constant 0 : i32
    return %arg1, %arg0, %c0_i32 : i32, i32, i32
  }
  func.func @transform_1(%arg0: i32, %arg1: i32) -> (i32, i32) {
    %c0_i32 = arith.constant 0 : i32
    %c0_i32_0 = arith.constant 0 : i32
    %c0_i32_1 = arith.constant 0 : i32
    return %c0_i32, %c0_i32_0 : i32, i32
  }
  func.func @transform_2(%arg0: i32, %arg1: i32) -> (i32, i32) {
    %c0_i32 = arith.constant 0 : i32
    %c0_i32_0 = arith.constant 0 : i32
    %c0_i32_1 = arith.constant 0 : i32
    return %c0_i32, %c0_i32_0 : i32, i32
  }
  func.func @transform_3(%arg0: i32, %arg1: i32) -> (i32, i32) {
    %c0_i32 = arith.constant 0 : i32
    %c0_i32_0 = arith.constant 0 : i32
    %c0_i32_1 = arith.constant 0 : i32
    return %c0_i32, %c0_i32_0 : i32, i32
  }
  func.func @transform_4(%arg0: i32, %arg1: i32) -> (i32, i32) {
    %c0_i32 = arith.constant 0 : i32
    %c0_i32_0 = arith.constant 0 : i32
    %c0_i32_1 = arith.constant 0 : i32
    return %c0_i32, %c0_i32_0 : i32, i32
  }
  func.func @transform_5(%arg0: i32, %arg1: i32) -> (i32, i32) {
    %c0_i32 = arith.constant 0 : i32
    %c0_i32_0 = arith.constant 0 : i32
    %c0_i32_1 = arith.constant 0 : i32
    return %c0_i32, %c0_i32_0 : i32, i32
  }
  func.func @transform_6(%arg0: i32, %arg1: i32) -> (i32, i32, i32) {
    %c0_i32 = arith.constant 0 : i32
    %c0_i32_0 = arith.constant 0 : i32
    return %arg1, %arg0, %c0_i32 : i32, i32, i32
  }
}

</mosaic_0001>

<bundles_post_ra>
// kernel: bayesian_lstm_model_forward.1
= control target key start
LH: loop header
LB: loop body
LE: loop exit
PB: predicated region body
PF: predicated region fallthrough
CT: control target
= control target key end

     0   :  { %vm27_vm0 = vcmask 261120   ;;  %v1602_v3 = vmov 0.0   ;;  %v1603_v4 = vmov 0.0|0.0   ;;  %vm1604_vm1 = vmmov 0   ;;  %s1606_s27 = smov 64   ;;  %s1607_s23 = smov 96   ;;  %s1916_s1 = inlined_call_operand.vmem [shape: f32[128,128], index: 1, kind: input, shape index: {}]   ;;  %s1917_s0 = inlined_call_operand.vmem [shape: f32[8,8,128], index: 0, kind: input, shape index: {}]   ;;  %s1918_s2 = inlined_call_operand.vmem [shape: f32[32,128], index: 2, kind: input, shape index: {}]   ;;  %s1919_s3 = inlined_call_operand.vmem [shape: f32[1,128], index: 3, kind: input, shape index: {}]   ;;  %s1920_s4 = inlined_call_operand.vmem [shape: f32[32,128], index: 4, kind: input, shape index: {}]   ;;  %s1921_s5 = inlined_call_operand.vmem [shape: f32[1,128], index: 5, kind: input, shape index: {}]   ;;  %s1922_s6 = inlined_call_operand.vmem [shape: f32[8,8,128], index: 6, kind: output, shape index: {}]  }
   0x1   :  { %v38_v0 = vld [vmem:[%s1916_s1] sm:$0xff]  ;;  %v39_v1 = vld [vmem:[%s1916_s1 + $0x8] sm:$0xff]  ;;  %v40_v2 = vld [vmem:[%s1916_s1 + $0x10] sm:$0xff]  ;;  %28 = vst.msk [vmem:[#allocation4] sm:$0xff] %vm27_vm0, %v1602_v3  ;;  %1482 = vmatprep.subr.bf16.mxu1 %v1603_v4  ;;  %1355 = vmatprep.mubr.msk.f32.mxu1 %vm1604_vm1, %v1602_v3 }
   0x2   :  { %29 = vst.msk [vmem:[#allocation5] sm:$0xff] %vm27_vm0, %v1602_v3  ;;  %v1444_v5 = vpack.c.bf16 %v39_v1, %v38_v0  ;;  %v41_v6 = vld [vmem:[%s1916_s1 + $0x18] sm:$0xff]  ;;  %v42_v8 = vld [vmem:[%s1916_s1 + $0x20] sm:$0xff]  ;;  %v43_v9 = vld [vmem:[%s1916_s1 + $0x28] sm:$0xff] }
   0x3   :  { %v1448_v7 = vpack.c.bf16 %v41_v6, %v40_v2  ;;  %v1452_v10 = vpack.c.bf16 %v43_v9, %v42_v8  ;;  %v44_v11 = vld [vmem:[%s1916_s1 + $0x30] sm:$0xff]  ;;  %v30_v12 = vld [vmem:[%s1917_s0] sm:$0xff]  ;;  %v45_v13 = vld [vmem:[%s1916_s1 + $0x38] sm:$0xff] }
   0x4   :  { %1445 = vmatprep.subr.bf16.mxu0 %v1444_v5  ;;  %1324 = vmatprep.mubr.f32.mxu0 %v30_v12  ;;  %v174_v14 = vld [vmem:[%s1918_s2] sm:$0xff]  ;;  %v175_v15 = vld [vmem:[%s1918_s2 + $0x8] sm:$0xff]  ;;  %v176_v17 = vld [vmem:[%s1918_s2 + $0x10] sm:$0xff]  ;;  %v1456_v19 = vpack.c.bf16 %v45_v13, %v44_v11 }
   0x5   :  { %1447 = vmatpush3.bf16.msra.mxu0 %v1444_v5  ;;  %v1683_v16 = vpack.c.bf16 %v175_v15, %v174_v14  ;;  %v177_v18 = vld [vmem:[%s1918_s2 + $0x18] sm:$0xff]  ;;  %v46_v20 = vld [vmem:[%s1916_s1 + $0x40] sm:$0xff]  ;;  %v47_v21 = vld [vmem:[%s1916_s1 + $0x48] sm:$0xff] }
   0x6   :  { %1449 = vmatprep.subr.bf16.mxu0 %v1448_v7  ;;  %v1699_v22 = vpack.c.bf16 %v177_v18, %v176_v17  ;;  %v1460_v23 = vpack.c.bf16 %v47_v21, %v46_v20  ;;  %v48_v24 = vld [vmem:[%s1916_s1 + $0x50] sm:$0xff]  ;;  %v49_v25 = vld [vmem:[%s1916_s1 + $0x58] sm:$0xff]  ;;  %v50_v27 = vld [vmem:[%s1916_s1 + $0x60] sm:$0xff] }
   0x7   :  { %1484 = vmatpush3.bf16.msra.mxu1 %v1683_v16  ;;  %v1464_v26 = vpack.c.bf16 %v49_v25, %v48_v24  ;;  %v51_v28 = vld [vmem:[%s1916_s1 + $0x68] sm:$0xff]  ;;  %v52_v30 = vld [vmem:[%s1916_s1 + $0x70] sm:$0xff]  ;;  %v53_v31 = vld [vmem:[%s1916_s1 + $0x78] sm:$0xff] }
   0x8   :  { %1485 = vmatprep.subr.bf16.mxu1 %v1603_v4  ;;  %v1468_v29 = vpack.c.bf16 %v51_v28, %v50_v27  ;;  %v1472_v32 = vpack.c.bf16 %v53_v31, %v52_v30  ;;  %v31_v33 = vld [vmem:[%s1917_s0 + $0x8] sm:$0xff]  ;;  %v32_v34 = vld [vmem:[%s1917_s0 + $0x10] sm:$0xff]  ;;  %v33_v35 = vld [vmem:[%s1917_s0 + $0x18] sm:$0xff] }
   0x9   :  { %1451 = vmatpush3.bf16.msra.mxu0 %v1448_v7  ;;  %v34_v36 = vld [vmem:[%s1917_s0 + $0x20] sm:$0xff]  ;;  %v35_v37 = vld [vmem:[%s1917_s0 + $0x28] sm:$0xff]  ;;  %v36_v38 = vld [vmem:[%s1917_s0 + $0x30] sm:$0xff] }
   0xa   :  { %1453 = vmatprep.subr.bf16.mxu0 %v1452_v10  ;;  %v37_v39 = vld [vmem:[%s1917_s0 + $0x38] sm:$0xff]  ;;  %v178_v40 = vld [vmem:[#allocation4] sm:$0xff]  ;;  %v179_v62 = vld [vmem:[#allocation5] sm:$0xff] }
   0xb   :  { %1487 = vmatpush3.bf16.msra.mxu1 %v1699_v22  ;;  %v1190_v41 = vld [vmem:[%s1919_s3] ss:$0 sm:$0xff]  ;;  %s1605_s3 = smov 32  }
   0xc   :  { %1488 = vmatprep.subr.bf16.mxu1 %v1603_v4 }
   0xd   :  { %1455 = vmatpush3.bf16.msra.mxu0 %v1452_v10 }
   0xe   :  { %1457 = vmatprep.subr.bf16.mxu0 %v1456_v19 }
  0x11   :  { %1459 = vmatpush3.bf16.msra.mxu0 %v1456_v19 }
  0x12   :  { %1461 = vmatprep.subr.bf16.mxu0 %v1460_v23 }
  0x15   :  { %1463 = vmatpush3.bf16.msra.mxu0 %v1460_v23 }
  0x16   :  { %1465 = vmatprep.subr.bf16.mxu0 %v1464_v26 }
  0x19   :  { %1467 = vmatpush3.bf16.msra.mxu0 %v1464_v26 }
  0x1a   :  { %1469 = vmatprep.subr.bf16.mxu0 %v1468_v29 }
  0x1d   :  { %1471 = vmatpush3.bf16.msra.mxu0 %v1468_v29 }
  0x1e   :  { %1473 = vmatprep.subr.bf16.mxu0 %v1472_v32 }
  0x21   :  { %1475 = vmatpush3.bf16.msra.mxu0 %v1472_v32 }
  0x22   :  { %1476 = vmatprep.subr.bf16.mxu0 %v1603_v4 }
  0x24   :  { %1325 = vmatmul.mubr.f32.vlgmr.msra.gmra.mrb[0].mxu0 %v31_v33 }
  0x25   :  { %1478 = vmatpush3.bf16.msra.mxu0 %v1683_v16  ;;  %1327 = vmatprep.mubr.f32.mxu0 %v32_v34 }
  0x26   :  { %1479 = vmatprep.subr.bf16.mxu0 %v1603_v4 }
  0x28   :  { %1328 = vmatmul.mubr.f32.gmra.mrb[2].mxu0 %v33_v35 }
  0x29   :  { %1330 = vmatprep.mubr.f32.mxu0 %v34_v36  ;;  %1481 = vmatpush3.bf16.msra.mxu0 %v1699_v22 }
  0x2a   :  { %1506 = vmatprep.subr.bf16.mxu0 %v1603_v4 }
  0x2c   :  { %1331 = vmatmul.mubr.f32.gmra.mrb[4].mxu0 %v35_v37 }
  0x2d   :  { %1333 = vmatprep.mubr.f32.mxu0 %v36_v38 }
  0x30   :  { %1334 = vmatmul.mubr.f32.gmra.mrb[6].mxu0 %v37_v39 }
  0x31   :  { %1344 = vmatprep.mubr.msk.f32.mxu0 %vm1604_vm1, %v1602_v3 }
  0x34   :  { %1345 = vmatmul.mubr.msk.f32.vlgmr.msra.gmra.mrb[8].mxu0 %vm27_vm0, %v178_v40 }
  0x35   :  { %1508 = vmatpush3.bf16.msra.mxu0 %v1683_v16  ;;  %1399 = vmatprep.mubr.msk.f32.mxu0 %vm1604_vm1, %v1602_v3 }
  0x36   :  { %1509 = vmatprep.subr.bf16.mxu0 %v1603_v4 }
  0x39   :  { %1511 = vmatpush3.bf16.msra.mxu0 %v1699_v22 }
  0x3a   :  { %1518 = vmatprep.subr.bf16.mxu0 %v1603_v4 }
  0xf7   :  { %v1326_v42 = vpop.f32.mrb[0].mxu0 }
  0xf8   :  { %v133_v43 = vadd.f32 %v1326_v42, %v1190_v41  ;;  %v127_v44 = vpop.f32.mrb[1].mxu0 }
  0xf9   :  { %v128_v57 = vadd.f32 %v1190_v41, %v127_v44 }
  0xfb   :  { %v1329_v45 = vpop.f32.mrb[2].mxu0 }
  0xfc   :  { %v1759_v46 = vadd.f32 %v1329_v45, %v1190_v41  ;;  %v137_v47 = vpop.f32.mrb[3].mxu0 }
  0xfd   :  { %v1761_v48 = vadd.f32 %v1190_v41, %v137_v47 }
  0xff   :  { %v1332_v49 = vpop.f32.mrb[4].mxu0 }
 0x100   :  { %v1763_v50 = vadd.f32 %v1332_v49, %v1190_v41  ;;  %v147_v51 = vpop.f32.mrb[5].mxu0 }
 0x101   :  { %v1765_v52 = vadd.f32 %v1190_v41, %v147_v51 }
 0x103   :  { %v1335_v53 = vpop.f32.mrb[6].mxu0 }
 0x104   :  { %v1767_v54 = vadd.f32 %v1335_v53, %v1190_v41  ;;  %v157_v55 = vpop.f32.mrb[7].mxu0 }
 0x105   :  { %v1769_v56 = vadd.f32 %v1190_v41, %v157_v55 }
 0x107   :  { %v251_v58 = vpop.f32.mrb[8].mxu0 }
 0x108   :  { %v255_v59 = vadd.f32 %v251_v58, %v128_v57  ;;  %v1346_v60 = vpop.f32.mrb[9].mxu0 }
 0x10a   :  { %1538 = vtanh.f32 %v255_v59  ;;  %v1192_v63 = vmul.f32 -1.442695, %v255_v59 }
 0x10c   :  { %1540 = vpow2.f32 %v1192_v63 }
 0x114   :  { %v1539_v61 = vpop.eup %1538 }
 0x115   :  { %269 = vrot.lane.b32.xlu0 %v1539_v61, %s1605_s3 }
 0x116   :  { %v1541_v0 = vpop.eup %1540 }
 0x117   :  { %v259_v1 = vadd.f32 1.0, %v1541_v0 }
 0x119   :  { %264 = vrot.lane.b32.xlu0 %v179_v62, %s1605_s3  ;;  %1542 = vrcp.f32 %v259_v1 }
 0x123   :  { %v1543_v2 = vpop.eup %1542 }
 0x187   :  { %v270_v5 = vpop.permute.xlu0 %269 }
 0x188   :  { %v272_v6 = vmul.f32 %v1543_v2, %v270_v5 }
 0x18a   :  { %274 = vrot.lane.b32.xlu1 %v272_v6, %s1605_s3 }
 0x18b   :  { %v265_v7 = vpop.permute.xlu0 %264 }
 0x18c   :  { %v267_v8 = vmul.f32 %v1543_v2, %v265_v7 }
 0x1fc   :  { %v275_v9 = vpop.permute.xlu1 %274 }
 0x1fd   :  { %v277_v10 = vadd.f32 %v275_v9, %v267_v8 }
 0x1ff   :  { %1544 = vtanh.f32 %v277_v10 }
 0x209   :  { %v1545_v11 = vpop.eup %1544 }
 0x20a   :  { %280 = vrot.lane.b32.xlu1 %v1545_v11, %s1605_s3 }
 0x27c   :  { %v281_v12 = vpop.permute.xlu1 %280 }
 0x27d   :  { %v283_v13 = vmul.f32 %v1543_v2, %v281_v12 }
 0x27f   :  { %285 = vrot.lane.b32.xlu0 %v283_v13, %s1606_s27 }
 0x2f1   :  { %v286_v14 = vpop.permute.xlu0 %285 }
 0x2f2   :  { %288 = vst.msk [vmem:[#allocation3] sm:$0xff] %vm27_vm0, %v286_v14  ;;  %1356 = vmatmul.mubr.msk.f32.vlgmr.msra.gmra.mrb[0].mxu1 %vm27_vm0, %v286_v14 }
 0x2f3   :  { %1490 = vmatpush3.bf16.msra.mxu1 %v1683_v16  ;;  %1366 = vmatprep.mubr.msk.f32.mxu1 %vm1604_vm1, %v1602_v3 }
 0x2f4   :  { %1491 = vmatprep.subr.bf16.mxu1 %v1603_v4 }
 0x2f7   :  { %1493 = vmatpush3.bf16.msra.mxu1 %v1699_v22 }
 0x2f8   :  { %1494 = vmatprep.subr.bf16.mxu1 %v1603_v4 }
 0x3c5   :  { %v359_v15 = vpop.f32.mrb[0].mxu1 }
 0x3c6   :  { %v363_v17 = vadd.f32 %v359_v15, %v133_v43  ;;  %v1357_v18 = vpop.f32.mrb[1].mxu1 }
 0x3c8   :  { %1546 = vtanh.f32 %v363_v17  ;;  %v1194_v20 = vmul.f32 -1.442695, %v363_v17 }
 0x3ca   :  { %1548 = vpow2.f32 %v1194_v20 }
 0x3d2   :  { %v1547_v19 = vpop.eup %1546 }
 0x3d3   :  { %373 = vrot.lane.b32.xlu1 %v1547_v19, %s1605_s3 }
 0x3d4   :  { %v1549_v21 = vpop.eup %1548 }
 0x3d5   :  { %v367_v23 = vadd.f32 1.0, %v1549_v21 }
 0x3d7   :  { %1550 = vrcp.f32 %v367_v23 }
 0x3e1   :  { %v1551_v24 = vpop.eup %1550 }
 0x3e2   :  { %v371_v27 = vmul.f32 %v1551_v24, %v277_v10 }
 0x445   :  { %v374_v25 = vpop.permute.xlu1 %373 }
 0x446   :  { %v376_v26 = vmul.f32 %v1551_v24, %v374_v25 }
 0x448   :  { %378 = vrot.lane.b32.xlu0 %v376_v26, %s1605_s3 }
 0x4ba   :  { %v379_v28 = vpop.permute.xlu0 %378 }
 0x4bb   :  { %v381_v29 = vadd.f32 %v379_v28, %v371_v27 }
 0x4bd   :  { %1552 = vtanh.f32 %v381_v29 }
 0x4c7   :  { %v1553_v30 = vpop.eup %1552 }
 0x4c8   :  { %384 = vrot.lane.b32.xlu1 %v1553_v30, %s1605_s3 }
 0x53a   :  { %v385_v31 = vpop.permute.xlu1 %384 }
 0x53b   :  { %v387_v32 = vmul.f32 %v1551_v24, %v385_v31 }
 0x53d   :  { %389 = vrot.lane.b32.xlu0 %v387_v32, %s1606_s27 }
 0x5af   :  { %v390_v33 = vpop.permute.xlu0 %389 }
 0x5b0   :  { %393 = vst.msk [vmem:[#allocation3 + $0x8] sm:$0xff] %vm27_vm0, %v390_v33  ;;  %1367 = vmatmul.mubr.msk.f32.vlgmr.msra.gmra.mrb[2].mxu1 %vm27_vm0, %v390_v33 }
 0x5b1   :  { %1496 = vmatpush3.bf16.msra.mxu1 %v1683_v16  ;;  %1377 = vmatprep.mubr.msk.f32.mxu1 %vm1604_vm1, %v1602_v3 }
 0x5b2   :  { %1497 = vmatprep.subr.bf16.mxu1 %v1603_v4 }
 0x5b5   :  { %1499 = vmatpush3.bf16.msra.mxu1 %v1699_v22 }
 0x5b6   :  { %1500 = vmatprep.subr.bf16.mxu1 %v1603_v4 }
 0x683   :  { %v464_v34 = vpop.f32.mrb[2].mxu1 }
 0x684   :  { %v468_v35 = vadd.f32 %v464_v34, %v1761_v48  ;;  %v1368_v36 = vpop.f32.mrb[3].mxu1 }
 0x686   :  { %1554 = vtanh.f32 %v468_v35  ;;  %v1196_v38 = vmul.f32 -1.442695, %v468_v35 }
 0x688   :  { %1556 = vpow2.f32 %v1196_v38 }
 0x690   :  { %v1555_v37 = vpop.eup %1554 }
 0x691   :  { %478 = vrot.lane.b32.xlu1 %v1555_v37, %s1605_s3  ;;  %v1039_v37 = vld [vmem:[%s1920_s4 + $0x8] sm:$0xff] }
 0x692   :  { %v1557_v39 = vpop.eup %1556 }
 0x693   :  { %v472_v40 = vadd.f32 1.0, %v1557_v39 }
 0x695   :  { %1558 = vrcp.f32 %v472_v40 }
 0x69f   :  { %v1559_v41 = vpop.eup %1558 }
 0x6a0   :  { %v476_v44 = vmul.f32 %v1559_v41, %v381_v29 }
 0x703   :  { %v479_v42 = vpop.permute.xlu1 %478 }
 0x704   :  { %v481_v43 = vmul.f32 %v1559_v41, %v479_v42  ;;  %v1040_v42 = vld [vmem:[%s1920_s4 + $0x10] sm:$0xff] }
 0x706   :  { %483 = vrot.lane.b32.xlu0 %v481_v43, %s1605_s3  ;;  %v1041_v43 = vld [vmem:[%s1920_s4 + $0x18] sm:$0xff] }
 0x778   :  { %v484_v45 = vpop.permute.xlu0 %483 }
 0x779   :  { %v486_v47 = vadd.f32 %v484_v45, %v476_v44  ;;  %v1528_v44 = vpack.c.bf16 %v1041_v43, %v1040_v42 }
 0x77b   :  { %1560 = vtanh.f32 %v486_v47 }
 0x785   :  { %v1561_v48 = vpop.eup %1560 }
 0x786   :  { %489 = vrot.lane.b32.xlu1 %v1561_v48, %s1605_s3  ;;  %v1031_v48 = vld [vmem:[#allocation3 + $0x8] sm:$0xff] }
 0x7f8   :  { %v490_v49 = vpop.permute.xlu1 %489 }
 0x7f9   :  { %v492_v51 = vmul.f32 %v1559_v41, %v490_v49 }
 0x7fb   :  { %494 = vrot.lane.b32.xlu0 %v492_v51, %s1606_s27 }
 0x86d   :  { %v495_v53 = vpop.permute.xlu0 %494 }
 0x86e   :  { %498 = vst.msk [vmem:[#allocation3 + $0x10] sm:$0xff] %vm27_vm0, %v495_v53  ;;  %1378 = vmatmul.mubr.msk.f32.vlgmr.msra.gmra.mrb[4].mxu1 %vm27_vm0, %v495_v53 }
 0x86f   :  { %1502 = vmatpush3.bf16.msra.mxu1 %v1683_v16  ;;  %1388 = vmatprep.mubr.msk.f32.mxu1 %vm1604_vm1, %v1602_v3 }
 0x870   :  { %1503 = vmatprep.subr.bf16.mxu1 %v1603_v4 }
 0x873   :  { %1505 = vmatpush3.bf16.msra.mxu1 %v1699_v22 }
 0x874   :  { %1512 = vmatprep.subr.bf16.mxu1 %v1603_v4 }
 0x875   :  { %v1032_v49 = vld [vmem:[#allocation3 + $0x10] sm:$0xff] }
 0x941   :  { %v569_v55 = vpop.f32.mrb[4].mxu1 }
 0x942   :  { %v573_v57 = vadd.f32 %v569_v55, %v1759_v46  ;;  %v1379_v58 = vpop.f32.mrb[5].mxu1 }
 0x944   :  { %1562 = vtanh.f32 %v573_v57  ;;  %v1198_v60 = vmul.f32 -1.442695, %v573_v57 }
 0x946   :  { %1564 = vpow2.f32 %v1198_v60  ;;  %v1865_v60 = vld [vmem:[%s1921_s5] ss:$0 sm:$0xff] }
 0x94e   :  { %v1563_v59 = vpop.eup %1562 }
 0x94f   :  { %583 = vrot.lane.b32.xlu1 %v1563_v59, %s1605_s3 }
 0x950   :  { %v1565_v61 = vpop.eup %1564 }
 0x951   :  { %v577_v62 = vadd.f32 1.0, %v1565_v61 }
 0x953   :  { %1566 = vrcp.f32 %v577_v62 }
 0x95d   :  { %v1567_v63 = vpop.eup %1566 }
 0x95e   :  { %v581_v2 = vmul.f32 %v1567_v63, %v486_v47  ;;  %v1030_v47 = vld [vmem:[#allocation3] sm:$0xff] }
 0x9c1   :  { %v584_v0 = vpop.permute.xlu1 %583 }
 0x9c2   :  { %v586_v1 = vmul.f32 %v1567_v63, %v584_v0 }
 0x9c4   :  { %588 = vrot.lane.b32.xlu0 %v586_v1, %s1605_s3 }
 0xa36   :  { %v589_v5 = vpop.permute.xlu0 %588 }
 0xa37   :  { %v591_v6 = vadd.f32 %v589_v5, %v581_v2 }
 0xa39   :  { %1568 = vtanh.f32 %v591_v6 }
 0xa43   :  { %v1569_v46 = vpop.eup %1568 }
 0xa44   :  { %594 = vrot.lane.b32.xlu1 %v1569_v46, %s1605_s3 }
 0xab6   :  { %v595_v7 = vpop.permute.xlu1 %594 }
 0xab7   :  { %v597_v8 = vmul.f32 %v1567_v63, %v595_v7 }
 0xab9   :  { %599 = vrot.lane.b32.xlu0 %v597_v8, %s1606_s27 }
 0xb2b   :  { %v600_v9 = vpop.permute.xlu0 %599 }
 0xb2c   :  { %603 = vst.msk [vmem:[#allocation3 + $0x18] sm:$0xff] %vm27_vm0, %v600_v9  ;;  %1389 = vmatmul.mubr.msk.f32.vlgmr.msra.gmra.mrb[6].mxu1 %vm27_vm0, %v600_v9 }
 0xb2d   :  { %1514 = vmatpush3.bf16.msra.mxu1 %v1683_v16  ;;  %1410 = vmatprep.mubr.msk.f32.mxu1 %vm1604_vm1, %v1602_v3 }
 0xb2e   :  { %1515 = vmatprep.subr.bf16.mxu1 %v1603_v4 }
 0xb31   :  { %1517 = vmatpush3.bf16.msra.mxu1 %v1699_v22 }
 0xb33   :  { %v1033_v51 = vld [vmem:[#allocation3 + $0x18] sm:$0xff] }
 0xbff   :  { %v674_v10 = vpop.f32.mrb[6].mxu1 }
 0xc00   :  { %v678_v11 = vadd.f32 %v674_v10, %v1765_v52  ;;  %v1390_v12 = vpop.f32.mrb[7].mxu1 }
 0xc02   :  { %1570 = vtanh.f32 %v678_v11  ;;  %v1200_v14 = vmul.f32 -1.442695, %v678_v11 }
 0xc04   :  { %1572 = vpow2.f32 %v1200_v14 }
 0xc0c   :  { %v1571_v13 = vpop.eup %1570 }
 0xc0d   :  { %688 = vrot.lane.b32.xlu1 %v1571_v13, %s1605_s3 }
 0xc0e   :  { %v1573_v15 = vpop.eup %1572 }
 0xc0f   :  { %v682_v17 = vadd.f32 1.0, %v1573_v15 }
 0xc11   :  { %1574 = vrcp.f32 %v682_v17 }
 0xc1b   :  { %v1575_v18 = vpop.eup %1574 }
 0xc1c   :  { %v686_v21 = vmul.f32 %v1575_v18, %v591_v6 }
 0xc7f   :  { %v689_v19 = vpop.permute.xlu1 %688 }
 0xc80   :  { %v691_v20 = vmul.f32 %v1575_v18, %v689_v19 }
 0xc82   :  { %693 = vrot.lane.b32.xlu0 %v691_v20, %s1605_s3 }
 0xcf4   :  { %v694_v23 = vpop.permute.xlu0 %693 }
 0xcf5   :  { %v696_v24 = vadd.f32 %v694_v23, %v686_v21 }
 0xcf7   :  { %1576 = vtanh.f32 %v696_v24 }
 0xd01   :  { %v1577_v52 = vpop.eup %1576 }
 0xd02   :  { %699 = vrot.lane.b32.xlu1 %v1577_v52, %s1605_s3 }
 0xd74   :  { %v700_v25 = vpop.permute.xlu1 %699 }
 0xd75   :  { %v702_v26 = vmul.f32 %v1575_v18, %v700_v25 }
 0xd77   :  { %704 = vrot.lane.b32.xlu0 %v702_v26, %s1606_s27 }
 0xde9   :  { %v705_v27 = vpop.permute.xlu0 %704 }
 0xdea   :  { %708 = vst.msk [vmem:[#allocation3 + $0x20] sm:$0xff] %vm27_vm0, %v705_v27  ;;  %1400 = vmatmul.mubr.msk.f32.vlgmr.msra.gmra.mrb[10].mxu0 %vm27_vm0, %v705_v27 }
 0xdeb   :  { %1520 = vmatpush3.bf16.msra.mxu0 %v1683_v16  ;;  %1421 = vmatprep.mubr.msk.f32.mxu0 %vm1604_vm1, %v1602_v3 }
 0xdec   :  { %1521 = vmatprep.subr.bf16.mxu0 %v1603_v4 }
 0xdef   :  { %1523 = vmatpush3.bf16.msra.mxu0 %v1699_v22 }
 0xdf1   :  { %v1034_v53 = vld [vmem:[#allocation3 + $0x20] sm:$0xff] }
 0xebd   :  { %v779_v28 = vpop.f32.mrb[10].mxu0 }
 0xebe   :  { %v783_v29 = vadd.f32 %v779_v28, %v1763_v50  ;;  %v1401_v30 = vpop.f32.mrb[11].mxu0  ;;  %v1038_v50 = vld [vmem:[%s1920_s4] sm:$0xff] }
 0xebf   :  { %v1524_v38 = vpack.c.bf16 %v1039_v37, %v1038_v50 }
 0xec0   :  { %1578 = vtanh.f32 %v783_v29  ;;  %v1202_v32 = vmul.f32 -1.442695, %v783_v29 }
 0xec1   :  { %1525 = vmatprep.subr.bf16.mxu1 %v1524_v38 }
 0xec2   :  { %1580 = vpow2.f32 %v1202_v32 }
 0xeca   :  { %v1579_v31 = vpop.eup %1578 }
 0xecb   :  { %793 = vrot.lane.b32.xlu1 %v1579_v31, %s1605_s3 }
 0xecc   :  { %v1581_v33 = vpop.eup %1580 }
 0xecd   :  { %v787_v34 = vadd.f32 1.0, %v1581_v33 }
 0xecf   :  { %1582 = vrcp.f32 %v787_v34 }
 0xed9   :  { %v1583_v16 = vpop.eup %1582 }
 0xeda   :  { %v791_v4 = vmul.f32 %v1583_v16, %v696_v24 }
 0xf3d   :  { %v794_v35 = vpop.permute.xlu1 %793 }
 0xf3e   :  { %v796_v3 = vmul.f32 %v1583_v16, %v794_v35 }
 0xf40   :  { %798 = vrot.lane.b32.xlu0 %v796_v3, %s1605_s3 }
 0xfb2   :  { %v799_v22 = vpop.permute.xlu0 %798 }
 0xfb3   :  { %v1836_v36 = vadd.f32 %v799_v22, %v791_v4 }
 0xfb5   :  { %1584 = vtanh.f32 %v1836_v36 }
 0xfbf   :  { %v1585_v39 = vpop.eup %1584 }
 0xfc0   :  { %804 = vrot.lane.b32.xlu1 %v1585_v39, %s1605_s3 }
0x1032   :  { %v805_v40 = vpop.permute.xlu1 %804 }
0x1033   :  { %v807_v41 = vmul.f32 %v1583_v16, %v805_v40 }
0x1035   :  { %809 = vrot.lane.b32.xlu0 %v807_v41, %s1606_s27 }
0x10a7   :  { %v810_v45 = vpop.permute.xlu0 %809 }
0x10a8   :  { %813 = vst.msk [vmem:[#allocation3 + $0x28] sm:$0xff] %vm27_vm0, %v810_v45  ;;  %1411 = vmatmul.mubr.msk.f32.vlgmr.msra.gmra.mrb[8].mxu1 %vm27_vm0, %v810_v45 }
0x10a9   :  { %1527 = vmatpush3.bf16.msra.mxu1 %v1524_v38  ;;  %1432 = vmatprep.mubr.msk.f32.mxu1 %vm27_vm0, %v1030_v47 }
0x10aa   :  { %1529 = vmatprep.subr.bf16.mxu1 %v1528_v44 }
0x10ad   :  { %1531 = vmatpush3.bf16.msra.mxu1 %v1528_v44 }
0x10af   :  { %v1035_v55 = vld [vmem:[#allocation3 + $0x28] sm:$0xff] }
0x10b0   :  { %1433 = vmatmul.mubr.msk.f32.vlgmr.msra.gmra.mrb[10].mxu1 %vm27_vm0, %v1031_v48 }
0x10b1   :  { %1435 = vmatprep.mubr.msk.f32.mxu1 %vm27_vm0, %v1032_v49 }
0x10b4   :  { %1436 = vmatmul.mubr.msk.f32.gmra.mrb[12].mxu1 %vm27_vm0, %v1033_v51 }
0x10b5   :  { %1438 = vmatprep.mubr.msk.f32.mxu1 %vm27_vm0, %v1034_v53 }
0x10b8   :  { %1439 = vmatmul.mubr.msk.f32.gmra.mrb[14].mxu1 %vm27_vm0, %v1035_v55 }
0x117b   :  { %v884_v57 = vpop.f32.mrb[8].mxu1 }
0x117c   :  { %v888_v58 = vadd.f32 %v884_v57, %v1769_v56  ;;  %v1412_v59 = vpop.f32.mrb[9].mxu1 }
0x117e   :  { %1586 = vtanh.f32 %v888_v58  ;;  %v1204_v10 = vmul.f32 -1.442695, %v888_v58 }
0x1180   :  { %1588 = vpow2.f32 %v1204_v10 }
0x1183   :  { %v1434_v61 = vpop.f32.mrb[10].mxu1 }
0x1184   :  { %v1145_v62 = vadd.f32 %v1434_v61, %v1865_v60  ;;  %v1139_v63 = vpop.f32.mrb[11].mxu1 }
0x1185   :  { %v1140_v0 = vadd.f32 %v1865_v60, %v1139_v63 }
0x1186   :  { %1179 = vst [vmem:[%s1922_s6 + $0x8] sm:$0xff] %v1145_v62 }
0x1187   :  { %1178 = vst [vmem:[%s1922_s6] sm:$0xff] %v1140_v0  ;;  %v1437_v56 = vpop.f32.mrb[12].mxu1 }
0x1188   :  { %v1587_v1 = vpop.eup %1586  ;;  %v1155_v2 = vadd.f32 %v1437_v56, %v1865_v60  ;;  %v1149_v5 = vpop.f32.mrb[13].mxu1 }
0x1189   :  { %v1150_v6 = vadd.f32 %v1865_v60, %v1149_v5  ;;  %898 = vrot.lane.b32.xlu1 %v1587_v1, %s1605_s3 }
0x118a   :  { %1181 = vst [vmem:[%s1922_s6 + $0x18] sm:$0xff] %v1155_v2  ;;  %v1589_v11 = vpop.eup %1588 }
0x118b   :  { %1180 = vst [vmem:[%s1922_s6 + $0x10] sm:$0xff] %v1150_v6  ;;  %v1440_v46 = vpop.f32.mrb[14].mxu1  ;;  %v892_v12 = vadd.f32 1.0, %v1589_v11 }
0x118c   :  { %v1165_v7 = vadd.f32 %v1440_v46, %v1865_v60  ;;  %v1159_v8 = vpop.f32.mrb[15].mxu1 }
0x118d   :  { %v1160_v9 = vadd.f32 %v1865_v60, %v1159_v8  ;;  %1590 = vrcp.f32 %v892_v12 }
0x118e   :  { %1183 = vst [vmem:[%s1922_s6 + $0x28] sm:$0xff] %v1165_v7 }
0x118f   :  { %1182 = vst [vmem:[%s1922_s6 + $0x20] sm:$0xff] %v1160_v9 }
0x1197   :  { %v1591_v13 = vpop.eup %1590 }
0x1198   :  { %v896_v17 = vmul.f32 %v1591_v13, %v1836_v36 }
0x11fb   :  { %v899_v14 = vpop.permute.xlu1 %898 }
0x11fc   :  { %v901_v15 = vmul.f32 %v1591_v13, %v899_v14 }
0x11fe   :  { %903 = vrot.lane.b32.xlu0 %v901_v15, %s1605_s3 }
0x1270   :  { %v904_v18 = vpop.permute.xlu0 %903 }
0x1271   :  { %v906_v19 = vadd.f32 %v904_v18, %v896_v17 }
0x1273   :  { %1592 = vtanh.f32 %v906_v19 }
0x127d   :  { %v1593_v20 = vpop.eup %1592 }
0x127e   :  { %909 = vrot.lane.b32.xlu1 %v1593_v20, %s1605_s3 }
0x12f0   :  { %v910_v21 = vpop.permute.xlu1 %909 }
0x12f1   :  { %v912_v23 = vmul.f32 %v1591_v13, %v910_v21 }
0x12f3   :  { %914 = vrot.lane.b32.xlu0 %v912_v23, %s1606_s27 }
0x1365   :  { %v915_v24 = vpop.permute.xlu0 %914 }
0x1366   :  { %918 = vst.msk [vmem:[#allocation3 + $0x30] sm:$0xff] %vm27_vm0, %v915_v24  ;;  %1422 = vmatmul.mubr.msk.f32.vlgmr.msra.gmra.mrb[12].mxu0 %vm27_vm0, %v915_v24 }
0x136d   :  { %v1036_v52 = vld [vmem:[#allocation3 + $0x30] sm:$0xff] }
0x136e   :  { %1441 = vmatprep.mubr.msk.f32.mxu1 %vm27_vm0, %v1036_v52 }
0x1439   :  { %v989_v25 = vpop.f32.mrb[12].mxu0 }
0x143a   :  { %v993_v26 = vadd.f32 %v989_v25, %v1767_v54  ;;  %v1423_v27 = vpop.f32.mrb[13].mxu0 }
0x143c   :  { %1594 = vtanh.f32 %v993_v26  ;;  %v1206_v29 = vmul.f32 -1.442695, %v993_v26 }
0x143e   :  { %1596 = vpow2.f32 %v1206_v29 }
0x1446   :  { %v1595_v28 = vpop.eup %1594 }
0x1447   :  { %1003 = vrot.lane.b32.xlu1 %v1595_v28, %s1605_s3 }
0x1448   :  { %v1597_v30 = vpop.eup %1596 }
0x1449   :  { %v997_v31 = vadd.f32 1.0, %v1597_v30 }
0x144b   :  { %1598 = vrcp.f32 %v997_v31 }
0x1455   :  { %v1599_v32 = vpop.eup %1598 }
0x1456   :  { %v1001_v16 = vmul.f32 %v1599_v32, %v906_v19 }
0x14b9   :  { %v1004_v33 = vpop.permute.xlu1 %1003 }
0x14ba   :  { %v1006_v34 = vmul.f32 %v1599_v32, %v1004_v33 }
0x14bc   :  { %1008 = vrot.lane.b32.xlu0 %v1006_v34, %s1605_s3 }
0x152e   :  { %v1009_v35 = vpop.permute.xlu0 %1008 }
0x152f   :  { %v1011_v3 = vadd.f32 %v1009_v35, %v1001_v16 }
0x1531   :  { %1600 = vtanh.f32 %v1011_v3 }
0x153b   :  { %v1601_v54 = vpop.eup %1600 }
0x153c   :  { %1014 = vrot.lane.b32.xlu1 %v1601_v54, %s1605_s3 }
0x1540   :  { %1026 = vrot.lane.b32.xlu1 %v1011_v3, %s1607_s23 }
0x15ae   :  { %v1015_v4 = vpop.permute.xlu1 %1014 }
0x15af   :  { %v1017_v22 = vmul.f32 %v1599_v32, %v1015_v4 }
0x15b1   :  { %1019 = vrot.lane.b32.xlu0 %v1017_v22, %s1606_s27 }
0x15b2   :  { %v1027_v36 = vpop.permute.xlu1 %1026 }
0x15b3   :  { %1029 = vst.msk [vmem:[#allocation5] sm:$0xff] %vm27_vm0, %v1027_v36 }
0x1623   :  { %v1020_v50 = vpop.permute.xlu0 %1019 }
0x1624   :  { %1023 = vst.msk [vmem:[#allocation3 + $0x38] sm:$0xff] %vm27_vm0, %v1020_v50  ;;  %1024 = vst.msk [vmem:[#allocation4] sm:$0xff] %vm27_vm0, %v1020_v50 }
0x162b   :  { %v1037_v37 = vld [vmem:[#allocation3 + $0x38] sm:$0xff] }
0x162c   :  { %1442 = vmatmul.mubr.msk.f32.gmra.mrb[16].mxu1 %vm27_vm0, %v1037_v37 }
0x16ff   :  { %v1443_v38 = vpop.f32.mrb[16].mxu1 }
0x1700   :  { %v1175_v39 = vadd.f32 %v1443_v38, %v1865_v60  ;;  %v1169_v40 = vpop.f32.mrb[17].mxu1 }
0x1701   :  { %v1170_v41 = vadd.f32 %v1865_v60, %v1169_v40 }
0x1702   :  { %1185 = vst [vmem:[%s1922_s6 + $0x38] sm:$0xff] %v1175_v39 }
0x1703   :  { %1184 = vst [vmem:[%s1922_s6 + $0x30] sm:$0xff] %v1170_v41 }

</bundles_post_ra>
